<compile_context>
chip_gen: v7x
topology: tpu7x:2x2x1
jax: 0.10.0
libtpu: 0.0.40
codegen_flags: <defaults>
</compile_context>

<pallas_src>
import functools

import jax
import jax.numpy as jnp
from jax.experimental import pallas as pl
from jax.experimental.pallas import tpu as pltpu


def _round_up(x, m):
    return ((x + m - 1) // m) * m


# ---------------------------------------------------------------------------
# Kernel 1: fused multi-scale nearest-neighbour point gather.
#   flat_ref / valid_ref : SMEM int32[ n_scales * B * N ]   (scalar prefetch)
#   fmap refs            : VMEM (HW_s, C) per scale, channels on the lane axis
#   out_ref              : VMEM (N, C * n_scales) lane-dense slab per batch
# ---------------------------------------------------------------------------
def _gather_kernel(flat_ref, valid_ref, *refs, n_scales, batch, n_points, cdim):
    fmap_refs = refs[:n_scales]
    out_ref = refs[n_scales]
    b = pl.program_id(0)

    for s in range(n_scales):
        base = s * batch * n_points
        rows = []
        for n in range(n_points):  # n_points is small & static -> unrolled
            off = base + b * n_points + n
            idx = flat_ref[off]                       # clamped flat pixel index
            vf = valid_ref[off].astype(jnp.float32)   # 0/1 -> padding_mode='zeros'
            row = fmap_refs[s][pl.ds(idx, 1), :]      # (1, C) lane-dense load
            rows.append(row * vf)
        out_ref[:, s * cdim:(s + 1) * cdim] = jnp.concatenate(rows, axis=0)


def _compute_sample_indices(point_coords_yx, sizes):
    """Nearest-neighbour pixel indices for grid_sample(mode='nearest',
    align_corners=False, padding_mode='zeros'). Returns flattened int32
    (flat_idx, valid) arrays of length n_scales * B * N, ordered [s, b, n]."""
    y = point_coords_yx[..., 0].astype(jnp.float32)   # [B, N]
    x = point_coords_yx[..., 1].astype(jnp.float32)   # [B, N]
    flat_list, valid_list = [], []
    for (H, W) in sizes:
        fy = y * jnp.float32(H) - 0.5
        fx = x * jnp.float32(W) - 0.5
        ry = jnp.round(fy)   # round half-to-even == nearbyint
        rx = jnp.round(fx)
        valid = (ry >= 0.0) & (ry <= jnp.float32(H - 1)) & \
                (rx >= 0.0) & (rx <= jnp.float32(W - 1))
        iy = jnp.clip(ry, 0.0, jnp.float32(H - 1)).astype(jnp.int32)
        ix = jnp.clip(rx, 0.0, jnp.float32(W - 1)).astype(jnp.int32)
        flat_list.append(iy * jnp.int32(W) + ix)
        valid_list.append(valid.astype(jnp.int32))
    flat_all = jnp.stack(flat_list, axis=0).reshape(-1).astype(jnp.int32)
    valid_all = jnp.stack(valid_list, axis=0).reshape(-1).astype(jnp.int32)
    return flat_all, valid_all


def sample_points_fused(fmaps, point_coords_yx):
    """fmaps: list of [B, C, H, W]; point_coords_yx: [B, N, 2] (y, x) in [0, 1].

    Returns the concatenated lane-dense slab [B, N, C * n_scales]."""
    B, C = fmaps[0].shape[0], fmaps[0].shape[1]
    N = point_coords_yx.shape[1]
    S = len(fmaps)
    sizes = [(int(f.shape[2]), int(f.shape[3])) for f in fmaps]
    Ct = C * S

    flat_all, valid_all = _compute_sample_indices(point_coords_yx, sizes)

    # NCHW -> (B, HW, C): channels on the lane axis for lane-dense row gathers.
    fmaps_hw_c = [
        jnp.transpose(f, (0, 2, 3, 1)).reshape(B, h * w, C).astype(jnp.float32)
        for f, (h, w) in zip(fmaps, sizes)
    ]

    kernel = functools.partial(
        _gather_kernel, n_scales=S, batch=B, n_points=N, cdim=C)

    grid_spec = pltpu.PrefetchScalarGridSpec(
        num_scalar_prefetch=2,
        grid=(B,),
        in_specs=[
            pl.BlockSpec((None, h * w, C), lambda b, *_: (b, 0, 0))
            for (h, w) in sizes
        ],
        out_specs=pl.BlockSpec((None, N, Ct), lambda b, *_: (b, 0, 0)),
    )

    slab = pl.pallas_call(
        kernel,
        out_shape=jax.ShapeDtypeStruct((B, N, Ct), jnp.float32),
        grid_spec=grid_spec,
        compiler_params=pltpu.CompilerParams(
            dimension_semantics=("parallel",),
            vmem_limit_bytes=32 * 1024 * 1024,
        ),
    )(flat_all, valid_all, *fmaps_hw_c)
    return slab


# ---------------------------------------------------------------------------
# Kernel 2: fused 3-layer MLP  (Linear -> ReLU -> Linear -> ReLU -> Linear)
#   bf16 operands, f32 MXU accumulation, biases/output f32.
# ---------------------------------------------------------------------------
def _mlp_kernel(x_ref, w1_ref, b1_ref, w2_ref, b2_ref, w3_ref, b3_ref, o_ref):
    x = x_ref[...].astype(jnp.bfloat16)
    h = jnp.dot(x, w1_ref[...], preferred_element_type=jnp.float32)
    h = jnp.maximum(h + b1_ref[...], 0.0)
    h = jnp.dot(h.astype(jnp.bfloat16), w2_ref[...],
                preferred_element_type=jnp.float32)
    h = jnp.maximum(h + b2_ref[...], 0.0)
    o_ref[...] = (
        jnp.dot(h.astype(jnp.bfloat16), w3_ref[...],
                preferred_element_type=jnp.float32) + b3_ref[...]
    ).astype(o_ref.dtype)


def mlp_forward(x, params):
    """x: [M, Din] f32; params = (w1,b1,w2,b2,w3,b3), weights stored [in, out]."""
    w1, b1, w2, b2, w3, b3 = params
    M, Din = x.shape
    Hd = w1.shape[1]
    Dout = w3.shape[1]

    # Adaptive row tile: fill the MXU (up to 128 rows) but never exceed what the
    # problem needs; pad only the remainder (no unconditional full copy).
    tm = min(128, _round_up(M, 8))
    Mp = pl.cdiv(M, tm) * tm
    xp = x.astype(jnp.float32)
    if Mp != M:
        xp = jnp.pad(xp, ((0, Mp - M), (0, 0)))

    w1b = w1.astype(jnp.bfloat16)
    w2b = w2.astype(jnp.bfloat16)
    w3b = w3.astype(jnp.bfloat16)

    # TODO(synk): for very large dim*n_scales / hidden_dim, pad Din/Hd/Dout to
    # multiples of 128 at param-init time for fully unmasked vld/vst.
    out = pl.pallas_call(
        _mlp_kernel,
        out_shape=jax.ShapeDtypeStruct((Mp, Dout), jnp.float32),
        grid=(Mp // tm,),
        in_specs=[
            pl.BlockSpec((tm, Din), lambda i: (i, 0)),
            pl.BlockSpec((Din, Hd), lambda i: (0, 0)),
            pl.BlockSpec((1, Hd), lambda i: (0, 0)),
            pl.BlockSpec((Hd, Hd), lambda i: (0, 0)),
            pl.BlockSpec((1, Hd), lambda i: (0, 0)),
            pl.BlockSpec((Hd, Dout), lambda i: (0, 0)),
            pl.BlockSpec((1, Dout), lambda i: (0, 0)),
        ],
        out_specs=pl.BlockSpec((tm, Dout), lambda i: (i, 0)),
        compiler_params=pltpu.CompilerParams(
            dimension_semantics=("parallel",),
            vmem_limit_bytes=32 * 1024 * 1024,
        ),
    )(xp, w1b, b1, w2b, b2, w3b, b3)
    return out[:M]


# ---------------------------------------------------------------------------
# Glue: parameter init + full forward (matching PETQueryInitializer.forward)
# ---------------------------------------------------------------------------
def init_params(key, dim, n_scales, hidden_dim=-1):
    if hidden_dim == -1:
        hidden_dim = dim
    din = dim * n_scales

    def linear(k, fan_in, fan_out):
        kw, kb = jax.random.split(k)
        bound = 1.0 / jnp.sqrt(jnp.float32(fan_in))
        w = jax.random.uniform(kw, (fan_in, fan_out), jnp.float32, -bound, bound)
        b = jax.random.uniform(kb, (1, fan_out), jnp.float32, -bound, bound)
        return w, b

    k1, k2, k3 = jax.random.split(key, 3)
    w1, b1 = linear(k1, din, hidden_dim)
    w2, b2 = linear(k2, hidden_dim, hidden_dim)
    w3, b3 = linear(k3, hidden_dim, dim)
    return (w1, b1, w2, b2, w3, b3)


def adapt_point_coords(point_coords, image_padding, padded_image_size):
    height, width = padded_image_size
    pad_right, pad_bottom = image_padding
    unpadded = jnp.asarray(
        [float(height - pad_bottom), float(width - pad_right)], jnp.float32
    )[None, None, :]
    pad = jnp.asarray([float(pad_bottom), float(pad_right)], jnp.float32)[None, None, :]
    return point_coords * unpadded / (unpadded + pad)


def pet_query_initializer_forward(
    params, fmaps, point_coords, image_padding=None, largest_scale=4
):
    """Returns (inits [B, N, C], sampled_features list of [B, C, N])."""
    if image_padding is not None:
        fmap_h = max(f.shape[-2] for f in fmaps)
        fmap_w = max(f.shape[-1] for f in fmaps)
        padded_image_size = (fmap_h * largest_scale, fmap_w * largest_scale)
        point_coords = adapt_point_coords(point_coords, image_padding, padded_image_size)

    # torch flips (y,x)->(x,y) only because grid_sample expects (x,y); our index
    # computation consumes (y,x) directly, so the two flips cancel out.
    slab = sample_points_fused(fmaps, point_coords)          # [B, N, C*S]
    B, N, _ = slab.shape
    C = fmaps[0].shape[1]
    S = len(fmaps)

    # Per-scale [B, C, N] views to match the torch return signature.
    sampled_features = [
        jnp.transpose(slab[:, :, s * C:(s + 1) * C], (0, 2, 1)) for s in range(S)
    ]

    inits = mlp_forward(slab.reshape(B * N, C * S), params).reshape(B, N, -1)
    return inits, sampled_features


# TODO(synk): mask_to_point/_mask_to_point use scipy distance_transform_edt on
# host numpy arrays (not part of forward); intentionally not ported to Pallas.

if __name__ == "__main__":
    key = jax.random.PRNGKey(0)
    B, C, N = 2, 8, 8           # batch, feature dim, number of points
    n_scales = 3
    hidden_dim = 32
    sizes = [(16, 16), (8, 8), (4, 4)]   # multi-scale spatial sizes

    k_f, k_p, k_w = jax.random.split(key, 3)
    fkeys = jax.random.split(k_f, n_scales)
    fmaps = [
        jax.random.normal(fk, (B, C, h, w), jnp.float32)
        for fk, (h, w) in zip(fkeys, sizes)
    ]
    # point coordinates in (y, x) order, normalized to [0, 1]
    point_coords = jax.random.uniform(k_p, (B, N, 2), jnp.float32, 0.05, 0.95)

    params = init_params(k_w, dim=C, n_scales=n_scales, hidden_dim=hidden_dim)

    inits, sampled = pet_query_initializer_forward(
        params, fmaps, point_coords, image_padding=(4, 8), largest_scale=4
    )
    jax.block_until_ready(inits)
    for s in sampled:
        jax.block_until_ready(s)

    assert inits.shape == (B, N, C), inits.shape
    assert all(s.shape == (B, C, N) for s in sampled)
    print("KERNEL_OK")
</pallas_src>

<mosaic_0001>
module attributes {stable_mosaic.version = 11 : i64} {
  func.func @_gather_kernel(%arg0: i32, %arg1: memref<48xi32, #tpu.memory_space<smem>>, %arg2: memref<48xi32, #tpu.memory_space<smem>>, %arg3: memref<1x256x8xf32, #tpu.memory_space<vmem>>, %arg4: memref<1x64x8xf32, #tpu.memory_space<vmem>>, %arg5: memref<1x16x8xf32, #tpu.memory_space<vmem>>, %arg6: memref<1x8x24xf32, #tpu.memory_space<vmem>>) attributes {dimension_semantics = [#tpu.dimension_semantics<parallel>], iteration_bounds = array<i64: 2>, scalar_prefetch = 2 : i64, scratch_operands = 0 : i64, tpu.core_type = #tpu.core_type<tc>, window_params = [{transform_indices = @transform_0, window_bounds = array<i64: 1, 256, 8>}, {transform_indices = @transform_1, window_bounds = array<i64: 1, 64, 8>}, {transform_indices = @transform_2, window_bounds = array<i64: 1, 16, 8>}, {transform_indices = @transform_3, window_bounds = array<i64: 1, 8, 24>}]} {
    %c8_i32 = arith.constant 8 : i32
    %0 = arith.muli %arg0, %c8_i32 : i32
    %c0_i32 = arith.constant 0 : i32
    %1 = arith.addi %c0_i32, %0 : i32
    %c0_i32_0 = arith.constant 0 : i32
    %2 = arith.addi %1, %c0_i32_0 : i32
    %3 = arith.index_cast %2 : i32 to index
    %4 = memref.load %arg1[%3] : memref<48xi32, #tpu.memory_space<smem>>
    %5 = arith.index_cast %2 : i32 to index
    %6 = memref.load %arg2[%5] : memref<48xi32, #tpu.memory_space<smem>>
    %7 = arith.sitofp %6 : i32 to f32
    %c0 = arith.constant 0 : index
    %8 = arith.index_cast %4 : i32 to index
    %c0_1 = arith.constant 0 : index
    %9 = vector.load %arg3[%c0, %8, %c0_1] : memref<1x256x8xf32, #tpu.memory_space<vmem>>, vector<1x1x8xf32>
    %10 = vector.shape_cast %9 : vector<1x1x8xf32> to vector<1x8xf32>
    %11 = vector.broadcast %7 : f32 to vector<1x8xf32>
    %12 = arith.mulf %10, %11 : vector<1x8xf32>
    %c8_i32_2 = arith.constant 8 : i32
    %13 = arith.muli %arg0, %c8_i32_2 : i32
    %c0_i32_3 = arith.constant 0 : i32
    %14 = arith.addi %c0_i32_3, %13 : i32
    %c1_i32 = arith.constant 1 : i32
    %15 = arith.addi %14, %c1_i32 : i32
    %16 = arith.index_cast %15 : i32 to index
    %17 = memref.load %arg1[%16] : memref<48xi32, #tpu.memory_space<smem>>
    %18 = arith.index_cast %15 : i32 to index
    %19 = memref.load %arg2[%18] : memref<48xi32, #tpu.memory_space<smem>>
    %20 = arith.sitofp %19 : i32 to f32
    %c0_4 = arith.constant 0 : index
    %21 = arith.index_cast %17 : i32 to index
    %c0_5 = arith.constant 0 : index
    %22 = vector.load %arg3[%c0_4, %21, %c0_5] : memref<1x256x8xf32, #tpu.memory_space<vmem>>, vector<1x1x8xf32>
    %23 = vector.shape_cast %22 : vector<1x1x8xf32> to vector<1x8xf32>
    %24 = vector.broadcast %20 : f32 to vector<1x8xf32>
    %25 = arith.mulf %23, %24 : vector<1x8xf32>
    %c8_i32_6 = arith.constant 8 : i32
    %26 = arith.muli %arg0, %c8_i32_6 : i32
    %c0_i32_7 = arith.constant 0 : i32
    %27 = arith.addi %c0_i32_7, %26 : i32
    %c2_i32 = arith.constant 2 : i32
    %28 = arith.addi %27, %c2_i32 : i32
    %29 = arith.index_cast %28 : i32 to index
    %30 = memref.load %arg1[%29] : memref<48xi32, #tpu.memory_space<smem>>
    %31 = arith.index_cast %28 : i32 to index
    %32 = memref.load %arg2[%31] : memref<48xi32, #tpu.memory_space<smem>>
    %33 = arith.sitofp %32 : i32 to f32
    %c0_8 = arith.constant 0 : index
    %34 = arith.index_cast %30 : i32 to index
    %c0_9 = arith.constant 0 : index
    %35 = vector.load %arg3[%c0_8, %34, %c0_9] : memref<1x256x8xf32, #tpu.memory_space<vmem>>, vector<1x1x8xf32>
    %36 = vector.shape_cast %35 : vector<1x1x8xf32> to vector<1x8xf32>
    %37 = vector.broadcast %33 : f32 to vector<1x8xf32>
    %38 = arith.mulf %36, %37 : vector<1x8xf32>
    %c8_i32_10 = arith.constant 8 : i32
    %39 = arith.muli %arg0, %c8_i32_10 : i32
    %c0_i32_11 = arith.constant 0 : i32
    %40 = arith.addi %c0_i32_11, %39 : i32
    %c3_i32 = arith.constant 3 : i32
    %41 = arith.addi %40, %c3_i32 : i32
    %42 = arith.index_cast %41 : i32 to index
    %43 = memref.load %arg1[%42] : memref<48xi32, #tpu.memory_space<smem>>
    %44 = arith.index_cast %41 : i32 to index
    %45 = memref.load %arg2[%44] : memref<48xi32, #tpu.memory_space<smem>>
    %46 = arith.sitofp %45 : i32 to f32
    %c0_12 = arith.constant 0 : index
    %47 = arith.index_cast %43 : i32 to index
    %c0_13 = arith.constant 0 : index
    %48 = vector.load %arg3[%c0_12, %47, %c0_13] : memref<1x256x8xf32, #tpu.memory_space<vmem>>, vector<1x1x8xf32>
    %49 = vector.shape_cast %48 : vector<1x1x8xf32> to vector<1x8xf32>
    %50 = vector.broadcast %46 : f32 to vector<1x8xf32>
    %51 = arith.mulf %49, %50 : vector<1x8xf32>
    %c8_i32_14 = arith.constant 8 : i32
    %52 = arith.muli %arg0, %c8_i32_14 : i32
    %c0_i32_15 = arith.constant 0 : i32
    %53 = arith.addi %c0_i32_15, %52 : i32
    %c4_i32 = arith.constant 4 : i32
    %54 = arith.addi %53, %c4_i32 : i32
    %55 = arith.index_cast %54 : i32 to index
    %56 = memref.load %arg1[%55] : memref<48xi32, #tpu.memory_space<smem>>
    %57 = arith.index_cast %54 : i32 to index
    %58 = memref.load %arg2[%57] : memref<48xi32, #tpu.memory_space<smem>>
    %59 = arith.sitofp %58 : i32 to f32
    %c0_16 = arith.constant 0 : index
    %60 = arith.index_cast %56 : i32 to index
    %c0_17 = arith.constant 0 : index
    %61 = vector.load %arg3[%c0_16, %60, %c0_17] : memref<1x256x8xf32, #tpu.memory_space<vmem>>, vector<1x1x8xf32>
    %62 = vector.shape_cast %61 : vector<1x1x8xf32> to vector<1x8xf32>
    %63 = vector.broadcast %59 : f32 to vector<1x8xf32>
    %64 = arith.mulf %62, %63 : vector<1x8xf32>
    %c8_i32_18 = arith.constant 8 : i32
    %65 = arith.muli %arg0, %c8_i32_18 : i32
    %c0_i32_19 = arith.constant 0 : i32
    %66 = arith.addi %c0_i32_19, %65 : i32
    %c5_i32 = arith.constant 5 : i32
    %67 = arith.addi %66, %c5_i32 : i32
    %68 = arith.index_cast %67 : i32 to index
    %69 = memref.load %arg1[%68] : memref<48xi32, #tpu.memory_space<smem>>
    %70 = arith.index_cast %67 : i32 to index
    %71 = memref.load %arg2[%70] : memref<48xi32, #tpu.memory_space<smem>>
    %72 = arith.sitofp %71 : i32 to f32
    %c0_20 = arith.constant 0 : index
    %73 = arith.index_cast %69 : i32 to index
    %c0_21 = arith.constant 0 : index
    %74 = vector.load %arg3[%c0_20, %73, %c0_21] : memref<1x256x8xf32, #tpu.memory_space<vmem>>, vector<1x1x8xf32>
    %75 = vector.shape_cast %74 : vector<1x1x8xf32> to vector<1x8xf32>
    %76 = vector.broadcast %72 : f32 to vector<1x8xf32>
    %77 = arith.mulf %75, %76 : vector<1x8xf32>
    %c8_i32_22 = arith.constant 8 : i32
    %78 = arith.muli %arg0, %c8_i32_22 : i32
    %c0_i32_23 = arith.constant 0 : i32
    %79 = arith.addi %c0_i32_23, %78 : i32
    %c6_i32 = arith.constant 6 : i32
    %80 = arith.addi %79, %c6_i32 : i32
    %81 = arith.index_cast %80 : i32 to index
    %82 = memref.load %arg1[%81] : memref<48xi32, #tpu.memory_space<smem>>
    %83 = arith.index_cast %80 : i32 to index
    %84 = memref.load %arg2[%83] : memref<48xi32, #tpu.memory_space<smem>>
    %85 = arith.sitofp %84 : i32 to f32
    %c0_24 = arith.constant 0 : index
    %86 = arith.index_cast %82 : i32 to index
    %c0_25 = arith.constant 0 : index
    %87 = vector.load %arg3[%c0_24, %86, %c0_25] : memref<1x256x8xf32, #tpu.memory_space<vmem>>, vector<1x1x8xf32>
    %88 = vector.shape_cast %87 : vector<1x1x8xf32> to vector<1x8xf32>
    %89 = vector.broadcast %85 : f32 to vector<1x8xf32>
    %90 = arith.mulf %88, %89 : vector<1x8xf32>
    %c8_i32_26 = arith.constant 8 : i32
    %91 = arith.muli %arg0, %c8_i32_26 : i32
    %c0_i32_27 = arith.constant 0 : i32
    %92 = arith.addi %c0_i32_27, %91 : i32
    %c7_i32 = arith.constant 7 : i32
    %93 = arith.addi %92, %c7_i32 : i32
    %94 = arith.index_cast %93 : i32 to index
    %95 = memref.load %arg1[%94] : memref<48xi32, #tpu.memory_space<smem>>
    %96 = arith.index_cast %93 : i32 to index
    %97 = memref.load %arg2[%96] : memref<48xi32, #tpu.memory_space<smem>>
    %98 = arith.sitofp %97 : i32 to f32
    %c0_28 = arith.constant 0 : index
    %99 = arith.index_cast %95 : i32 to index
    %c0_29 = arith.constant 0 : index
    %100 = vector.load %arg3[%c0_28, %99, %c0_29] : memref<1x256x8xf32, #tpu.memory_space<vmem>>, vector<1x1x8xf32>
    %101 = vector.shape_cast %100 : vector<1x1x8xf32> to vector<1x8xf32>
    %102 = vector.broadcast %98 : f32 to vector<1x8xf32>
    %103 = arith.mulf %101, %102 : vector<1x8xf32>
    %104 = tpu.concatenate %12, %25, %38, %51, %64, %77, %90, %103 in 0 : vector<1x8xf32>, vector<1x8xf32>, vector<1x8xf32>, vector<1x8xf32>, vector<1x8xf32>, vector<1x8xf32>, vector<1x8xf32>, vector<1x8xf32> -> vector<8x8xf32>
    %c0_30 = arith.constant 0 : index
    %c0_31 = arith.constant 0 : index
    %c0_32 = arith.constant 0 : index
    %105 = vector.load %arg6[%c0_30, %c0_31, %c0_32] : memref<1x8x24xf32, #tpu.memory_space<vmem>>, vector<1x8x8xf32>
    %106 = vector.shape_cast %105 : vector<1x8x8xf32> to vector<8x8xf32>
    %107 = vector.shape_cast %104 : vector<8x8xf32> to vector<1x8x8xf32>
    tpu.vector_store %arg6[%c0_30, %c0_31, %c0_32], %107 {strides = array<i32>} : memref<1x8x24xf32, #tpu.memory_space<vmem>>, vector<1x8x8xf32>,
    %c8_i32_33 = arith.constant 8 : i32
    %108 = arith.muli %arg0, %c8_i32_33 : i32
    %c16_i32 = arith.constant 16 : i32
    %109 = arith.addi %c16_i32, %108 : i32
    %c0_i32_34 = arith.constant 0 : i32
    %110 = arith.addi %109, %c0_i32_34 : i32
    %111 = arith.index_cast %110 : i32 to index
    %112 = memref.load %arg1[%111] : memref<48xi32, #tpu.memory_space<smem>>
    %113 = arith.index_cast %110 : i32 to index
    %114 = memref.load %arg2[%113] : memref<48xi32, #tpu.memory_space<smem>>
    %115 = arith.sitofp %114 : i32 to f32
    %c0_35 = arith.constant 0 : index
    %116 = arith.index_cast %112 : i32 to index
    %c0_36 = arith.constant 0 : index
    %117 = vector.load %arg4[%c0_35, %116, %c0_36] : memref<1x64x8xf32, #tpu.memory_space<vmem>>, vector<1x1x8xf32>
    %118 = vector.shape_cast %117 : vector<1x1x8xf32> to vector<1x8xf32>
    %119 = vector.broadcast %115 : f32 to vector<1x8xf32>
    %120 = arith.mulf %118, %119 : vector<1x8xf32>
    %c8_i32_37 = arith.constant 8 : i32
    %121 = arith.muli %arg0, %c8_i32_37 : i32
    %c16_i32_38 = arith.constant 16 : i32
    %122 = arith.addi %c16_i32_38, %121 : i32
    %c1_i32_39 = arith.constant 1 : i32
    %123 = arith.addi %122, %c1_i32_39 : i32
    %124 = arith.index_cast %123 : i32 to index
    %125 = memref.load %arg1[%124] : memref<48xi32, #tpu.memory_space<smem>>
    %126 = arith.index_cast %123 : i32 to index
    %127 = memref.load %arg2[%126] : memref<48xi32, #tpu.memory_space<smem>>
    %128 = arith.sitofp %127 : i32 to f32
    %c0_40 = arith.constant 0 : index
    %129 = arith.index_cast %125 : i32 to index
    %c0_41 = arith.constant 0 : index
    %130 = vector.load %arg4[%c0_40, %129, %c0_41] : memref<1x64x8xf32, #tpu.memory_space<vmem>>, vector<1x1x8xf32>
    %131 = vector.shape_cast %130 : vector<1x1x8xf32> to vector<1x8xf32>
    %132 = vector.broadcast %128 : f32 to vector<1x8xf32>
    %133 = arith.mulf %131, %132 : vector<1x8xf32>
    %c8_i32_42 = arith.constant 8 : i32
    %134 = arith.muli %arg0, %c8_i32_42 : i32
    %c16_i32_43 = arith.constant 16 : i32
    %135 = arith.addi %c16_i32_43, %134 : i32
    %c2_i32_44 = arith.constant 2 : i32
    %136 = arith.addi %135, %c2_i32_44 : i32
    %137 = arith.index_cast %136 : i32 to index
    %138 = memref.load %arg1[%137] : memref<48xi32, #tpu.memory_space<smem>>
    %139 = arith.index_cast %136 : i32 to index
    %140 = memref.load %arg2[%139] : memref<48xi32, #tpu.memory_space<smem>>
    %141 = arith.sitofp %140 : i32 to f32
    %c0_45 = arith.constant 0 : index
    %142 = arith.index_cast %138 : i32 to index
    %c0_46 = arith.constant 0 : index
    %143 = vector.load %arg4[%c0_45, %142, %c0_46] : memref<1x64x8xf32, #tpu.memory_space<vmem>>, vector<1x1x8xf32>
    %144 = vector.shape_cast %143 : vector<1x1x8xf32> to vector<1x8xf32>
    %145 = vector.broadcast %141 : f32 to vector<1x8xf32>
    %146 = arith.mulf %144, %145 : vector<1x8xf32>
    %c8_i32_47 = arith.constant 8 : i32
    %147 = arith.muli %arg0, %c8_i32_47 : i32
    %c16_i32_48 = arith.constant 16 : i32
    %148 = arith.addi %c16_i32_48, %147 : i32
    %c3_i32_49 = arith.constant 3 : i32
    %149 = arith.addi %148, %c3_i32_49 : i32
    %150 = arith.index_cast %149 : i32 to index
    %151 = memref.load %arg1[%150] : memref<48xi32, #tpu.memory_space<smem>>
    %152 = arith.index_cast %149 : i32 to index
    %153 = memref.load %arg2[%152] : memref<48xi32, #tpu.memory_space<smem>>
    %154 = arith.sitofp %153 : i32 to f32
    %c0_50 = arith.constant 0 : index
    %155 = arith.index_cast %151 : i32 to index
    %c0_51 = arith.constant 0 : index
    %156 = vector.load %arg4[%c0_50, %155, %c0_51] : memref<1x64x8xf32, #tpu.memory_space<vmem>>, vector<1x1x8xf32>
    %157 = vector.shape_cast %156 : vector<1x1x8xf32> to vector<1x8xf32>
    %158 = vector.broadcast %154 : f32 to vector<1x8xf32>
    %159 = arith.mulf %157, %158 : vector<1x8xf32>
    %c8_i32_52 = arith.constant 8 : i32
    %160 = arith.muli %arg0, %c8_i32_52 : i32
    %c16_i32_53 = arith.constant 16 : i32
    %161 = arith.addi %c16_i32_53, %160 : i32
    %c4_i32_54 = arith.constant 4 : i32
    %162 = arith.addi %161, %c4_i32_54 : i32
    %163 = arith.index_cast %162 : i32 to index
    %164 = memref.load %arg1[%163] : memref<48xi32, #tpu.memory_space<smem>>
    %165 = arith.index_cast %162 : i32 to index
    %166 = memref.load %arg2[%165] : memref<48xi32, #tpu.memory_space<smem>>
    %167 = arith.sitofp %166 : i32 to f32
    %c0_55 = arith.constant 0 : index
    %168 = arith.index_cast %164 : i32 to index
    %c0_56 = arith.constant 0 : index
    %169 = vector.load %arg4[%c0_55, %168, %c0_56] : memref<1x64x8xf32, #tpu.memory_space<vmem>>, vector<1x1x8xf32>
    %170 = vector.shape_cast %169 : vector<1x1x8xf32> to vector<1x8xf32>
    %171 = vector.broadcast %167 : f32 to vector<1x8xf32>
    %172 = arith.mulf %170, %171 : vector<1x8xf32>
    %c8_i32_57 = arith.constant 8 : i32
    %173 = arith.muli %arg0, %c8_i32_57 : i32
    %c16_i32_58 = arith.constant 16 : i32
    %174 = arith.addi %c16_i32_58, %173 : i32
    %c5_i32_59 = arith.constant 5 : i32
    %175 = arith.addi %174, %c5_i32_59 : i32
    %176 = arith.index_cast %175 : i32 to index
    %177 = memref.load %arg1[%176] : memref<48xi32, #tpu.memory_space<smem>>
    %178 = arith.index_cast %175 : i32 to index
    %179 = memref.load %arg2[%178] : memref<48xi32, #tpu.memory_space<smem>>
    %180 = arith.sitofp %179 : i32 to f32
    %c0_60 = arith.constant 0 : index
    %181 = arith.index_cast %177 : i32 to index
    %c0_61 = arith.constant 0 : index
    %182 = vector.load %arg4[%c0_60, %181, %c0_61] : memref<1x64x8xf32, #tpu.memory_space<vmem>>, vector<1x1x8xf32>
    %183 = vector.shape_cast %182 : vector<1x1x8xf32> to vector<1x8xf32>
    %184 = vector.broadcast %180 : f32 to vector<1x8xf32>
    %185 = arith.mulf %183, %184 : vector<1x8xf32>
    %c8_i32_62 = arith.constant 8 : i32
    %186 = arith.muli %arg0, %c8_i32_62 : i32
    %c16_i32_63 = arith.constant 16 : i32
    %187 = arith.addi %c16_i32_63, %186 : i32
    %c6_i32_64 = arith.constant 6 : i32
    %188 = arith.addi %187, %c6_i32_64 : i32
    %189 = arith.index_cast %188 : i32 to index
    %190 = memref.load %arg1[%189] : memref<48xi32, #tpu.memory_space<smem>>
    %191 = arith.index_cast %188 : i32 to index
    %192 = memref.load %arg2[%191] : memref<48xi32, #tpu.memory_space<smem>>
    %193 = arith.sitofp %192 : i32 to f32
    %c0_65 = arith.constant 0 : index
    %194 = arith.index_cast %190 : i32 to index
    %c0_66 = arith.constant 0 : index
    %195 = vector.load %arg4[%c0_65, %194, %c0_66] : memref<1x64x8xf32, #tpu.memory_space<vmem>>, vector<1x1x8xf32>
    %196 = vector.shape_cast %195 : vector<1x1x8xf32> to vector<1x8xf32>
    %197 = vector.broadcast %193 : f32 to vector<1x8xf32>
    %198 = arith.mulf %196, %197 : vector<1x8xf32>
    %c8_i32_67 = arith.constant 8 : i32
    %199 = arith.muli %arg0, %c8_i32_67 : i32
    %c16_i32_68 = arith.constant 16 : i32
    %200 = arith.addi %c16_i32_68, %199 : i32
    %c7_i32_69 = arith.constant 7 : i32
    %201 = arith.addi %200, %c7_i32_69 : i32
    %202 = arith.index_cast %201 : i32 to index
    %203 = memref.load %arg1[%202] : memref<48xi32, #tpu.memory_space<smem>>
    %204 = arith.index_cast %201 : i32 to index
    %205 = memref.load %arg2[%204] : memref<48xi32, #tpu.memory_space<smem>>
    %206 = arith.sitofp %205 : i32 to f32
    %c0_70 = arith.constant 0 : index
    %207 = arith.index_cast %203 : i32 to index
    %c0_71 = arith.constant 0 : index
    %208 = vector.load %arg4[%c0_70, %207, %c0_71] : memref<1x64x8xf32, #tpu.memory_space<vmem>>, vector<1x1x8xf32>
    %209 = vector.shape_cast %208 : vector<1x1x8xf32> to vector<1x8xf32>
    %210 = vector.broadcast %206 : f32 to vector<1x8xf32>
    %211 = arith.mulf %209, %210 : vector<1x8xf32>
    %212 = tpu.concatenate %120, %133, %146, %159, %172, %185, %198, %211 in 0 : vector<1x8xf32>, vector<1x8xf32>, vector<1x8xf32>, vector<1x8xf32>, vector<1x8xf32>, vector<1x8xf32>, vector<1x8xf32>, vector<1x8xf32> -> vector<8x8xf32>
    %c0_72 = arith.constant 0 : index
    %c0_73 = arith.constant 0 : index
    %c8 = arith.constant 8 : index
    %213 = vector.load %arg6[%c0_72, %c0_73, %c8] : memref<1x8x24xf32, #tpu.memory_space<vmem>>, vector<1x8x8xf32>
    %214 = vector.shape_cast %213 : vector<1x8x8xf32> to vector<8x8xf32>
    %215 = vector.shape_cast %212 : vector<8x8xf32> to vector<1x8x8xf32>
    tpu.vector_store %arg6[%c0_72, %c0_73, %c8], %215 {strides = array<i32>} : memref<1x8x24xf32, #tpu.memory_space<vmem>>, vector<1x8x8xf32>,
    %c8_i32_74 = arith.constant 8 : i32
    %216 = arith.muli %arg0, %c8_i32_74 : i32
    %c32_i32 = arith.constant 32 : i32
    %217 = arith.addi %c32_i32, %216 : i32
    %c0_i32_75 = arith.constant 0 : i32
    %218 = arith.addi %217, %c0_i32_75 : i32
    %219 = arith.index_cast %218 : i32 to index
    %220 = memref.load %arg1[%219] : memref<48xi32, #tpu.memory_space<smem>>
    %221 = arith.index_cast %218 : i32 to index
    %222 = memref.load %arg2[%221] : memref<48xi32, #tpu.memory_space<smem>>
    %223 = arith.sitofp %222 : i32 to f32
    %c0_76 = arith.constant 0 : index
    %224 = arith.index_cast %220 : i32 to index
    %c0_77 = arith.constant 0 : index
    %225 = vector.load %arg5[%c0_76, %224, %c0_77] : memref<1x16x8xf32, #tpu.memory_space<vmem>>, vector<1x1x8xf32>
    %226 = vector.shape_cast %225 : vector<1x1x8xf32> to vector<1x8xf32>
    %227 = vector.broadcast %223 : f32 to vector<1x8xf32>
    %228 = arith.mulf %226, %227 : vector<1x8xf32>
    %c8_i32_78 = arith.constant 8 : i32
    %229 = arith.muli %arg0, %c8_i32_78 : i32
    %c32_i32_79 = arith.constant 32 : i32
    %230 = arith.addi %c32_i32_79, %229 : i32
    %c1_i32_80 = arith.constant 1 : i32
    %231 = arith.addi %230, %c1_i32_80 : i32
    %232 = arith.index_cast %231 : i32 to index
    %233 = memref.load %arg1[%232] : memref<48xi32, #tpu.memory_space<smem>>
    %234 = arith.index_cast %231 : i32 to index
    %235 = memref.load %arg2[%234] : memref<48xi32, #tpu.memory_space<smem>>
    %236 = arith.sitofp %235 : i32 to f32
    %c0_81 = arith.constant 0 : index
    %237 = arith.index_cast %233 : i32 to index
    %c0_82 = arith.constant 0 : index
    %238 = vector.load %arg5[%c0_81, %237, %c0_82] : memref<1x16x8xf32, #tpu.memory_space<vmem>>, vector<1x1x8xf32>
    %239 = vector.shape_cast %238 : vector<1x1x8xf32> to vector<1x8xf32>
    %240 = vector.broadcast %236 : f32 to vector<1x8xf32>
    %241 = arith.mulf %239, %240 : vector<1x8xf32>
    %c8_i32_83 = arith.constant 8 : i32
    %242 = arith.muli %arg0, %c8_i32_83 : i32
    %c32_i32_84 = arith.constant 32 : i32
    %243 = arith.addi %c32_i32_84, %242 : i32
    %c2_i32_85 = arith.constant 2 : i32
    %244 = arith.addi %243, %c2_i32_85 : i32
    %245 = arith.index_cast %244 : i32 to index
    %246 = memref.load %arg1[%245] : memref<48xi32, #tpu.memory_space<smem>>
    %247 = arith.index_cast %244 : i32 to index
    %248 = memref.load %arg2[%247] : memref<48xi32, #tpu.memory_space<smem>>
    %249 = arith.sitofp %248 : i32 to f32
    %c0_86 = arith.constant 0 : index
    %250 = arith.index_cast %246 : i32 to index
    %c0_87 = arith.constant 0 : index
    %251 = vector.load %arg5[%c0_86, %250, %c0_87] : memref<1x16x8xf32, #tpu.memory_space<vmem>>, vector<1x1x8xf32>
    %252 = vector.shape_cast %251 : vector<1x1x8xf32> to vector<1x8xf32>
    %253 = vector.broadcast %249 : f32 to vector<1x8xf32>
    %254 = arith.mulf %252, %253 : vector<1x8xf32>
    %c8_i32_88 = arith.constant 8 : i32
    %255 = arith.muli %arg0, %c8_i32_88 : i32
    %c32_i32_89 = arith.constant 32 : i32
    %256 = arith.addi %c32_i32_89, %255 : i32
    %c3_i32_90 = arith.constant 3 : i32
    %257 = arith.addi %256, %c3_i32_90 : i32
    %258 = arith.index_cast %257 : i32 to index
    %259 = memref.load %arg1[%258] : memref<48xi32, #tpu.memory_space<smem>>
    %260 = arith.index_cast %257 : i32 to index
    %261 = memref.load %arg2[%260] : memref<48xi32, #tpu.memory_space<smem>>
    %262 = arith.sitofp %261 : i32 to f32
    %c0_91 = arith.constant 0 : index
    %263 = arith.index_cast %259 : i32 to index
    %c0_92 = arith.constant 0 : index
    %264 = vector.load %arg5[%c0_91, %263, %c0_92] : memref<1x16x8xf32, #tpu.memory_space<vmem>>, vector<1x1x8xf32>
    %265 = vector.shape_cast %264 : vector<1x1x8xf32> to vector<1x8xf32>
    %266 = vector.broadcast %262 : f32 to vector<1x8xf32>
    %267 = arith.mulf %265, %266 : vector<1x8xf32>
    %c8_i32_93 = arith.constant 8 : i32
    %268 = arith.muli %arg0, %c8_i32_93 : i32
    %c32_i32_94 = arith.constant 32 : i32
    %269 = arith.addi %c32_i32_94, %268 : i32
    %c4_i32_95 = arith.constant 4 : i32
    %270 = arith.addi %269, %c4_i32_95 : i32
    %271 = arith.index_cast %270 : i32 to index
    %272 = memref.load %arg1[%271] : memref<48xi32, #tpu.memory_space<smem>>
    %273 = arith.index_cast %270 : i32 to index
    %274 = memref.load %arg2[%273] : memref<48xi32, #tpu.memory_space<smem>>
    %275 = arith.sitofp %274 : i32 to f32
    %c0_96 = arith.constant 0 : index
    %276 = arith.index_cast %272 : i32 to index
    %c0_97 = arith.constant 0 : index
    %277 = vector.load %arg5[%c0_96, %276, %c0_97] : memref<1x16x8xf32, #tpu.memory_space<vmem>>, vector<1x1x8xf32>
    %278 = vector.shape_cast %277 : vector<1x1x8xf32> to vector<1x8xf32>
    %279 = vector.broadcast %275 : f32 to vector<1x8xf32>
    %280 = arith.mulf %278, %279 : vector<1x8xf32>
    %c8_i32_98 = arith.constant 8 : i32
    %281 = arith.muli %arg0, %c8_i32_98 : i32
    %c32_i32_99 = arith.constant 32 : i32
    %282 = arith.addi %c32_i32_99, %281 : i32
    %c5_i32_100 = arith.constant 5 : i32
    %283 = arith.addi %282, %c5_i32_100 : i32
    %284 = arith.index_cast %283 : i32 to index
    %285 = memref.load %arg1[%284] : memref<48xi32, #tpu.memory_space<smem>>
    %286 = arith.index_cast %283 : i32 to index
    %287 = memref.load %arg2[%286] : memref<48xi32, #tpu.memory_space<smem>>
    %288 = arith.sitofp %287 : i32 to f32
    %c0_101 = arith.constant 0 : index
    %289 = arith.index_cast %285 : i32 to index
    %c0_102 = arith.constant 0 : index
    %290 = vector.load %arg5[%c0_101, %289, %c0_102] : memref<1x16x8xf32, #tpu.memory_space<vmem>>, vector<1x1x8xf32>
    %291 = vector.shape_cast %290 : vector<1x1x8xf32> to vector<1x8xf32>
    %292 = vector.broadcast %288 : f32 to vector<1x8xf32>
    %293 = arith.mulf %291, %292 : vector<1x8xf32>
    %c8_i32_103 = arith.constant 8 : i32
    %294 = arith.muli %arg0, %c8_i32_103 : i32
    %c32_i32_104 = arith.constant 32 : i32
    %295 = arith.addi %c32_i32_104, %294 : i32
    %c6_i32_105 = arith.constant 6 : i32
    %296 = arith.addi %295, %c6_i32_105 : i32
    %297 = arith.index_cast %296 : i32 to index
    %298 = memref.load %arg1[%297] : memref<48xi32, #tpu.memory_space<smem>>
    %299 = arith.index_cast %296 : i32 to index
    %300 = memref.load %arg2[%299] : memref<48xi32, #tpu.memory_space<smem>>
    %301 = arith.sitofp %300 : i32 to f32
    %c0_106 = arith.constant 0 : index
    %302 = arith.index_cast %298 : i32 to index
    %c0_107 = arith.constant 0 : index
    %303 = vector.load %arg5[%c0_106, %302, %c0_107] : memref<1x16x8xf32, #tpu.memory_space<vmem>>, vector<1x1x8xf32>
    %304 = vector.shape_cast %303 : vector<1x1x8xf32> to vector<1x8xf32>
    %305 = vector.broadcast %301 : f32 to vector<1x8xf32>
    %306 = arith.mulf %304, %305 : vector<1x8xf32>
    %c8_i32_108 = arith.constant 8 : i32
    %307 = arith.muli %arg0, %c8_i32_108 : i32
    %c32_i32_109 = arith.constant 32 : i32
    %308 = arith.addi %c32_i32_109, %307 : i32
    %c7_i32_110 = arith.constant 7 : i32
    %309 = arith.addi %308, %c7_i32_110 : i32
    %310 = arith.index_cast %309 : i32 to index
    %311 = memref.load %arg1[%310] : memref<48xi32, #tpu.memory_space<smem>>
    %312 = arith.index_cast %309 : i32 to index
    %313 = memref.load %arg2[%312] : memref<48xi32, #tpu.memory_space<smem>>
    %314 = arith.sitofp %313 : i32 to f32
    %c0_111 = arith.constant 0 : index
    %315 = arith.index_cast %311 : i32 to index
    %c0_112 = arith.constant 0 : index
    %316 = vector.load %arg5[%c0_111, %315, %c0_112] : memref<1x16x8xf32, #tpu.memory_space<vmem>>, vector<1x1x8xf32>
    %317 = vector.shape_cast %316 : vector<1x1x8xf32> to vector<1x8xf32>
    %318 = vector.broadcast %314 : f32 to vector<1x8xf32>
    %319 = arith.mulf %317, %318 : vector<1x8xf32>
    %320 = tpu.concatenate %228, %241, %254, %267, %280, %293, %306, %319 in 0 : vector<1x8xf32>, vector<1x8xf32>, vector<1x8xf32>, vector<1x8xf32>, vector<1x8xf32>, vector<1x8xf32>, vector<1x8xf32>, vector<1x8xf32> -> vector<8x8xf32>
    %c0_113 = arith.constant 0 : index
    %c0_114 = arith.constant 0 : index
    %c16 = arith.constant 16 : index
    %321 = vector.load %arg6[%c0_113, %c0_114, %c16] : memref<1x8x24xf32, #tpu.memory_space<vmem>>, vector<1x8x8xf32>
    %322 = vector.shape_cast %321 : vector<1x8x8xf32> to vector<8x8xf32>
    %323 = vector.shape_cast %320 : vector<8x8xf32> to vector<1x8x8xf32>
    tpu.vector_store %arg6[%c0_113, %c0_114, %c16], %323 {strides = array<i32>} : memref<1x8x24xf32, #tpu.memory_space<vmem>>, vector<1x8x8xf32>,
    return
  }
  func.func @transform_0(%arg0: i32, %arg1: memref<48xi32, #tpu.memory_space<smem>>, %arg2: memref<48xi32, #tpu.memory_space<smem>>) -> (i32, i32, i32) {
    %c0_i32 = arith.constant 0 : i32
    %c0_i32_0 = arith.constant 0 : i32
    %c0_i32_1 = arith.constant 0 : i32
    return %arg0, %c0_i32, %c0_i32_0 : i32, i32, i32
  }
  func.func @transform_1(%arg0: i32, %arg1: memref<48xi32, #tpu.memory_space<smem>>, %arg2: memref<48xi32, #tpu.memory_space<smem>>) -> (i32, i32, i32) {
    %c0_i32 = arith.constant 0 : i32
    %c0_i32_0 = arith.constant 0 : i32
    %c0_i32_1 = arith.constant 0 : i32
    return %arg0, %c0_i32, %c0_i32_0 : i32, i32, i32
  }
  func.func @transform_2(%arg0: i32, %arg1: memref<48xi32, #tpu.memory_space<smem>>, %arg2: memref<48xi32, #tpu.memory_space<smem>>) -> (i32, i32, i32) {
    %c0_i32 = arith.constant 0 : i32
    %c0_i32_0 = arith.constant 0 : i32
    %c0_i32_1 = arith.constant 0 : i32
    return %arg0, %c0_i32, %c0_i32_0 : i32, i32, i32
  }
  func.func @transform_3(%arg0: i32, %arg1: memref<48xi32, #tpu.memory_space<smem>>, %arg2: memref<48xi32, #tpu.memory_space<smem>>) -> (i32, i32, i32) {
    %c0_i32 = arith.constant 0 : i32
    %c0_i32_0 = arith.constant 0 : i32
    %c0_i32_1 = arith.constant 0 : i32
    return %arg0, %c0_i32, %c0_i32_0 : i32, i32, i32
  }
}

</mosaic_0001>

<bundles_post_ra>
// kernel: tpu_custom_call.1
= control target key start
LH: loop header
LB: loop body
LE: loop exit
PB: predicated region body
PF: predicated region fallthrough
CT: control target
= control target key end

     0   :  { %s1144_s0 = inlined_call_operand.vmem [shape: s32[48], index: 0, kind: input, shape index: {}]   ;;  %s1145_s2 = inlined_call_operand.vmem [shape: f32[2,256,8], index: 2, kind: input, shape index: {}]   ;;  %s1146_s3 = inlined_call_operand.vmem [shape: f32[2,64,8], index: 3, kind: input, shape index: {}]   ;;  %s1147_s4 = inlined_call_operand.vmem [shape: f32[2,16,8], index: 4, kind: input, shape index: {}]   ;;  %s1148_s5 = inlined_call_operand.hbm [shape: f32[2,8,24], index: 5, kind: output, shape index: {}]   ;;  %s1149_s1 = inlined_call_operand.vmem [shape: s32[48], index: 1, kind: input, shape index: {}]  }
   0x1   :  { %1167 = sst [smem:[#allocation26_spill]] %s1146_s3  ;;  %s10_s20 = sshll.u32 %s1144_s0, 4  ;;  %s11_s20 = int_to_ptr.vmem [resolvable:$true] %s10_s20 }
   0x2   :  { %1168 = sst [smem:[#allocation27_spill]] %s1147_s4  ;;  %s14_s23 = sshll.u32 %s1149_s1, 4  ;;  %s15_s23 = int_to_ptr.vmem [resolvable:$true] %s14_s23 }
   0x3   :  { %1169 = sst [smem:[#allocation28_spill]] %s1148_s5  ;;  %s701_s24 = scalar_lea.vmem %s11_s20, 16 }
   0x4   :  { %p702_p0 = scmp.ne.s32.totalorder %s11_s20, %s701_s24  ;;  %p706_p1 = scmp.lt.s32.totalorder %s11_s20, %s11_s20 }
   0x5   :  { %p707_p2 = scmp.lt.s32.totalorder %s701_s24, %s701_s24 }
   0x7   :  { %p708_p3 = por %p707_p2, %p706_p1 }
   0x9   :  { %p709_p4 = pnand %p708_p3, %p702_p0 }
   0xb   :  { %712 = shalt.err (!%p709_p4)  }
   0xc   :  { %s791_s25 = smov [#allocation3]   ;;  %s713_s26 = scalar_lea.vmem %s15_s23, 16 }
   0xd   :  { %13 = dma.vmem_to_smem %s11_s20, 16, %s791_s25, [#allocation2] }
   0xe   :  { %p714_p5 = scmp.ne.s32.totalorder %s15_s23, %s713_s26  ;;  %p718_p6 = scmp.lt.s32.totalorder %s15_s23, %s15_s23 }
   0xf   :  { %p719_p7 = scmp.lt.s32.totalorder %s713_s26, %s713_s26 }
  0x11   :  { %p720_p8 = por %p719_p7, %p718_p6 }
  0x13   :  { %p721_p9 = pnand %p720_p8, %p714_p5 }
  0x15   :  { %724 = shalt.err (!%p721_p9)  }
  0x16   :  { %s792_s0 = smov [#allocation4]  }
  0x17   :  { %17 = dma.vmem_to_smem %s15_s23, 16, %s792_s0, [#allocation2] }
  0x18   :  { %769 = dma.done.wait [#allocation2], 32 }
  0x19   :  { %770 = vsyncadd [#allocation2], 4294967264 }
  0x1a   :  { %19 = sfence }
  0x1b   :  { %20 = vsyncpa [#allocation6], 0 }
  0x1c   :  { %22 = vsyncpa [#allocation6 + $0x1], 0  ;;  %s832_s1 = smov 0   ;;  %s834_s27 = smov 0  }
  0x1d   :  { %s836_s28 = smov 0   ;;  %s838_s29 = smov 0  }
  0x1e LB: > { %1170 = sst [smem:[#allocation9_spill]] %s777_s1  ;;  %s853_s30 = sadd.s32 4294967295, %s789_s29   ;;  %s789_s29 = sphi %s838_s29, %s1213_s29   ;;  %s785_s28 = sphi %s836_s28, %s1216_s28   ;;  %s781_s27 = sphi %s834_s27, %s1215_s27   ;;  %s777_s1 = sphi %s832_s1, %s1214_s1  }
  0x1f   : > { %1171 = sst [smem:[#allocation10_spill]] %s781_s27  ;;  %s639_s6 = sadd.s32 4294967294, %s789_s29  }
  0x20   : > { %1172 = sst [smem:[#allocation11_spill]] %s785_s28  ;;  %s857_s7 = sadd.s32 1, %s789_s29  }
  0x21   : > { %1173 = sst [smem:[#allocation12_spill]] %s789_s29  ;;  %s113_s8 = sadd.s32 1, %s785_s28 }
  0x22   : > { %1174 = sst [smem:[#allocation13_spill]] %s853_s30  ;;  %s110_s9 = ssub.s32 %s789_s29, %s857_s7 }
  0x23   : > { %1175 = sst [smem:[#allocation14_spill]] %s857_s7  ;;  %p123_p10 = scmp.ne.s32.totalorder %s785_s28, %s781_s27 }
  0x24   : > { %p111_p11 = scmp.eq.s32.totalorder %s110_s9, 0  ;;  %p124_p12 = scmp.eq.s32.totalorder %s853_s30, 1 }
  0x25   : > { %p129_p13 = scmp.ne.s32.totalorder %s781_s27, %s777_s1  ;;  %p130_p0 = scmp.eq.s32.totalorder %s639_s6, 1 }
  0x26   : > { %s868_s10 = scalar_select %p111_p11, %s785_s28, %s113_s8  }
  0x27   : > { %p870_p1 = por %p124_p12, %p123_p10  ;;  %p874_p2 = por %p130_p0, %p129_p13 }
  0x28   : > { %1176 = sst [smem:[#allocation15_spill]] %s868_s10  ;;  %p642_p3 = scmp.ge.s32.totalorder %s789_s29, 1 }
  0x29   : > { %s1177_s11 = scalar_select %p870_p1, 1, 0 }
  0x2a   : > { %s1179_s12 = scalar_select %p874_p2, 1, 0 }
  0x2b   : > { %1178 = sst [smem:[#allocation16_spill]] %s1177_s11  ;;  %p172_p4 = scmp.lt.s32.totalorder %s789_s29, 3 }
  0x2c   : > { %1180 = sst [smem:[#allocation17_spill]] %s1179_s12 }
  0x2d   : > { %p173_p5 = pnand %p642_p3, %p172_p4 }
  0x2f   : > { %176 = sbr.rel (%p173_p5) target bundleno = 277 (0x115), region = 32 }
  0x36   : > { %p206_p6 = scmp.lt.s32.totalorder %s853_s30, 1  ;;  %s882_s13 = sshll.u32 %s853_s30, 3  ;;  %vm306_vm0 = vcmask 1040384   ;;  %vm308_vm1 = vcmask 1041408   ;;  %vm310_vm2 = vcmask 1042432   ;;  %vm312_vm3 = vcmask 1043456  }
  0x37   : > { %s885_s14 = sld [smem:[#allocation3 + %s882_s13]]  ;;  %s229_s17 = sadd.s32 1, %s882_s13  ;;  %vm314_vm4 = vcmask 1044480   ;;  %vm316_vm5 = vcmask 1045504   ;;  %vm318_vm6 = vcmask 1046528   ;;  %vm320_vm7 = vcmask 64512  }
  0x38   : > { %s888_s15 = sld [smem:[#allocation4 + %s882_s13]]  ;;  %s237_s18 = sadd.s32 2, %s882_s13  ;;  %vm418_vm8 = vcmask 130112   ;;  %vm516_vm9 = vcmask 195712  }
  0x39   : > { %s891_s16 = scalar_select %p206_p6, %s853_s30, 1 }
  0x3a   : > { %s896_s20 = sld [smem:[#allocation3 + %s229_s17]]  ;;  %s245_s6 = sadd.s32 3, %s882_s13 }
  0x3b   : > { %s656_s19 = sshll.u32 %s891_s16, 6  ;;  %s1181_s3 = sld [smem:[#allocation26_spill]] }
  0x3c   : > { %s903_s24 = sld [smem:[#allocation4 + %s229_s17]]  ;;  %s253_s21 = sadd.s32 4, %s882_s13 }
  0x3d   : > { %s905_s25 = sld [smem:[#allocation3 + %s237_s18]]  ;;  %s277_s28 = sadd.s32 7, %s882_s13 }
  0x3e   : > { %s907_s26 = sld [smem:[#allocation4 + %s237_s18]]  ;;  %s330_s10 = sadd.s32 17, %s882_s13 }
  0x3f   : > { %s911_s8 = sld [smem:[#allocation3 + %s245_s6]] }
  0x40   : > { %s913_s9 = sld [smem:[#allocation4 + %s245_s6]]  ;;  %s269_s6 = sadd.s32 6, %s882_s13 }
  0x41   : > { %s901_s23 = scalar_lea.vmem %s1181_s3, %s656_s19  ;;  %s261_s19 = sadd.s32 5, %s882_s13 }
  0x42   : > { %s917_s17 = sld [smem:[#allocation3 + %s253_s21]]  ;;  %s354_s3 = sadd.s32 20, %s882_s13 }
  0x43   : > { %s919_s22 = sld [smem:[#allocation4 + %s253_s21]] }
  0x44   : > { %s922_s18 = sld [smem:[#allocation3 + %s261_s19]] }
  0x45   : > { %1182 = sst [smem:[#allocation18_spill]] %s911_s8 }
  0x46   : > { %1183 = sst [smem:[#allocation19_spill]] %s913_s9 }
  0x47   : > { %s925_s0 = sld [smem:[#allocation4 + %s261_s19]]  ;;  %s322_s19 = sadd.s32 16, %s882_s13 }
  0x48   : > { %1184 = sst [smem:[#allocation20_spill]] %s917_s17  ;;  %s346_s17 = sadd.s32 19, %s882_s13 }
  0x49   : > { %1185 = sst [smem:[#allocation21_spill]] %s919_s22 }
  0x4a   : > { %1186 = sst [smem:[#allocation22_spill]] %s922_s18 }
  0x4b   : > { %s930_s12 = sld [smem:[#allocation3 + %s269_s6]] }
  0x4c   : > { %s932_s1 = sld [smem:[#allocation4 + %s269_s6]]  ;;  %s338_s6 = sadd.s32 18, %s882_s13 }
  0x4d   : > { %1187 = sst [smem:[#allocation23_spill]] %s925_s0 }
  0x4e   : > { %s934_s21 = sld [smem:[#allocation3 + %s277_s28]] }
  0x4f   : > { %s937_s29 = sld [smem:[#allocation4 + %s277_s28]] }
  0x50   : > { %s323_s11 = sld [smem:[#allocation3 + %s322_s19]] }
  0x51   : > { %1188 = sst [smem:[#allocation24_spill]] %s930_s12 }
  0x52   : > { %s324_s7 = sld [smem:[#allocation4 + %s322_s19]] }
  0x53   : > { %s331_s30 = sld [smem:[#allocation3 + %s330_s10]] }
  0x54   : > { %1189 = sst [smem:[#allocation25_spill]] %s934_s21 }
  0x55   : > { %s332_s27 = sld [smem:[#allocation4 + %s330_s10]]  ;;  %s280_s18 = scvt.s32.f32 %s937_s29 }
  0x56   : > { %s339_s12 = sld [smem:[#allocation3 + %s338_s6]]  ;;  %s326_s22 = scalar_lea.vmem %s901_s23, %s323_s11 }
  0x57   : > { %s340_s21 = sld [smem:[#allocation4 + %s338_s6]]  ;;  %v327_v0 = vld [vmem:[%s326_s22] sm:$0x1]  ;;  %s362_s11 = sadd.s32 21, %s882_s13 }
  0x58   : > { %s347_s28 = sld [smem:[#allocation3 + %s346_s17]]  ;;  %s325_s8 = scvt.s32.f32 %s324_s7 }
  0x59   : > { %s334_s9 = scalar_lea.vmem %s901_s23, %s331_s30  ;;  %s348_s19 = sld [smem:[#allocation4 + %s346_s17]] }
  0x5a   : > { %v335_v1 = vld [vmem:[%s334_s9] sm:$0x1]  ;;  %v328_v2 = vstv %s325_s8  ;;  %s355_s0 = sld [smem:[#allocation3 + %s354_s3]]  ;;  %s370_s7 = sadd.s32 22, %s882_s13 }
  0x5b   : > { %s333_s5 = scvt.s32.f32 %s332_s27  ;;  %s356_s6 = sld [smem:[#allocation4 + %s354_s3]]  ;;  %v329_v5 = vmul.f32 %v328_v2, %v327_v0 }
  0x5c   : > { %s342_s10 = scalar_lea.vmem %s901_s23, %s339_s12  ;;  %s363_s27 = sld [smem:[#allocation3 + %s362_s11]] }
  0x5d   : > { %v336_v3 = vstv %s333_s5  ;;  %s341_s4 = scvt.s32.f32 %s340_s21  ;;  %v343_v4 = vld [vmem:[%s342_s10] sm:$0x1]  ;;  %s953_s9 = sld [smem:[#allocation4 + %s362_s11]] }
  0x5e   : > { %v337_v6 = vmul.f32 %v336_v3, %v335_v1  ;;  %s350_s30 = scalar_lea.vmem %s901_s23, %s347_s28  ;;  %s955_s8 = sld [smem:[#allocation3 + %s370_s7]]  ;;  %v283_v1 = vstv %s280_s18 }
  0x5f   : > { %v344_v7 = vstv %s341_s4  ;;  %s349_s5 = scvt.s32.f32 %s348_s19  ;;  %v351_v10 = vld [vmem:[%s350_s30] sm:$0x1]  ;;  %s957_s3 = sld [smem:[#allocation4 + %s370_s7]] }
  0x60   : > { %v345_v8 = vmul.f32 %v344_v7, %v343_v4  ;;  %v387_v9 = vrot.slane %v337_v6, 7  ;;  %s358_s12 = scalar_lea.vmem %s901_s23, %s355_s0  ;;  %s378_s17 = sadd.s32 23, %s882_s13 }
  0x61   : > { %v352_v13 = vstv %s349_s5  ;;  %s357_s4 = scvt.s32.f32 %s356_s6  ;;  %v359_v14 = vld [vmem:[%s358_s12] sm:$0x1]  ;;  %s962_s22 = sld [smem:[#allocation3 + %s378_s17]] }
  0x62   : > { %v390_v11 = vrot.slane %v345_v8, 6  ;;  %v407_v12 = vsel %vm306_vm0, %v329_v5, %v387_v9  ;;  %v353_v15 = vmul.f32 %v352_v13, %v351_v10  ;;  %s964_s21 = sld [smem:[#allocation4 + %s378_s17]]  ;;  %s366_s0 = scalar_lea.vmem %s901_s23, %s363_s27 }
  0x63   : > { %v360_v16 = vstv %s357_s4  ;;  %s655_s28 = sshll.u32 %s891_s16, 8  ;;  %s365_s19 = scvt.s32.f32 %s953_s9  ;;  %v367_v19 = vld [vmem:[%s366_s0] sm:$0x1] }
  0x64   : > { %v408_v17 = vsel %vm308_vm1, %v407_v12, %v390_v11  ;;  %v361_v18 = vmul.f32 %v360_v16, %v359_v14  ;;  %s374_s10 = scalar_lea.vmem %s901_s23, %s955_s8  ;;  %v393_v20 = vrot.slane %v353_v15, 5  ;;  %s1190_s6 = scvt.s32.f32 %s903_s24 }
  0x65   : > { %s373_s11 = scvt.s32.f32 %s957_s3  ;;  %v375_v22 = vld [vmem:[%s374_s10] sm:$0x1]  ;;  %s1191_s27 = sld [smem:[#allocation19_spill]]  ;;  %v368_v24 = vstv %s365_s19 }
  0x66   : > { %v235_v21 = vstv %s1190_s6  ;;  %s978_s5 = scalar_lea.vmem %s1145_s2, %s655_s28  ;;  %s1192_s12 = scvt.s32.f32 %s907_s26  ;;  %v396_v25 = vrot.slane %v361_v18, 4  ;;  %v409_v26 = vsel %vm310_vm2, %v408_v17, %v393_v20  ;;  %v369_v28 = vmul.f32 %v368_v24, %v367_v19 }
  0x67   : > { %s225_s24 = scalar_lea.vmem %s978_s5, %s885_s14  ;;  %s233_s9 = scalar_lea.vmem %s978_s5, %s896_s20  ;;  %v376_v29 = vstv %s373_s11 }
  0x68   : > { %v243_v23 = vstv %s1192_s12  ;;  %s1193_s8 = scvt.s32.f32 %s888_s15  ;;  %s1194_s3 = sld [smem:[#allocation18_spill]]  ;;  %v226_v30 = vld [vmem:[%s225_s24] sm:$0x1]  ;;  %v377_v33 = vmul.f32 %v376_v29, %v375_v22  ;;  %v410_v35 = vsel %vm312_vm3, %v409_v26, %v396_v25  ;;  %v399_v38 = vrot.slane %v369_v28, 3 }
  0x69   : > { %s382_s17 = scalar_lea.vmem %s901_s23, %s962_s22  ;;  %s1195_s26 = sld [smem:[#allocation20_spill]]  ;;  %v234_v31 = vld [vmem:[%s233_s9] sm:$0x1] }
  0x6a   : > { %v227_v27 = vstv %s1193_s8  ;;  %s1196_s4 = sld [smem:[#allocation22_spill]]  ;;  %s241_s0 = scalar_lea.vmem %s978_s5, %s905_s25  ;;  %v383_v34 = vld [vmem:[%s382_s17] sm:$0x1]  ;;  %v236_v36 = vmul.f32 %v235_v21, %v234_v31  ;;  %v402_v42 = vrot.slane %v377_v33, 2  ;;  %v411_v47 = vsel %vm314_vm4, %v410_v35, %v399_v38 }
  0x6b   : > { %s1197_s28 = scvt.s32.f32 %s1191_s27  ;;  %s1198_s14 = sld [smem:[#allocation24_spill]]  ;;  %v242_v37 = vld [vmem:[%s241_s0] sm:$0x1]  ;;  %v228_v43 = vmul.f32 %v227_v27, %v226_v30 }
  0x6c   : > { %s381_s15 = scvt.s32.f32 %s964_s21  ;;  %s1199_s20 = sld [smem:[#allocation25_spill]]  ;;  %v244_v39 = vmul.f32 %v243_v23, %v242_v37  ;;  %v286_v44 = vrot.slane %v236_v36, 7  ;;  %v412_v50 = vsel %vm316_vm5, %v411_v47, %v402_v42 }
  0x6d   : > { %v251_v32 = vstv %s1197_s28  ;;  %s1200_s19 = sld [smem:[#allocation21_spill]]  ;;  %s1202_s11 = sld [smem:[#allocation23_spill]] }
  0x6e   : > { %s249_s23 = scalar_lea.vmem %s978_s5, %s1194_s3  ;;  %v384_v41 = vstv %s381_s15  ;;  %s657_s7 = sshll.u32 %s891_s16, 4  ;;  %v289_v51 = vrot.slane %v244_v39, 6  ;;  %v307_v56 = vsel %vm306_vm0, %v228_v43, %v286_v44 }
  0x6f   : > { %v250_v40 = vld [vmem:[%s249_s23] sm:$0x1]  ;;  %s257_s25 = scalar_lea.vmem %s978_s5, %s1195_s26  ;;  %v385_v46 = vmul.f32 %v384_v41, %v383_v34  ;;  %s420_s30 = sadd.s32 32, %s882_s13 }
  0x70   : > { %s265_s22 = scalar_lea.vmem %s978_s5, %s1196_s4  ;;  %v252_v48 = vmul.f32 %v251_v32, %v250_v40  ;;  %v258_v49 = vld [vmem:[%s257_s25] sm:$0x1]  ;;  %s1203_s24 = sld [smem:[#allocation27_spill]]  ;;  %v309_v59 = vsel %vm308_vm1, %v307_v56, %v289_v51 }
  0x71   : > { %s273_s21 = scalar_lea.vmem %s978_s5, %s1198_s14  ;;  %s1018_s8 = sld [smem:[#allocation3 + %s420_s30]]  ;;  %v405_v52 = vrot.slane %v385_v46, 1  ;;  %v266_v55 = vld [vmem:[%s265_s22] sm:$0x1] }
  0x72   : > { %s281_s10 = scalar_lea.vmem %s978_s5, %s1199_s20  ;;  %s1020_s3 = sld [smem:[#allocation4 + %s420_s30]]  ;;  %v292_v58 = vrot.slane %v252_v48, 5  ;;  %v274_v62 = vld [vmem:[%s273_s21] sm:$0x1] }
  0x73   : > { %s1201_s6 = scvt.s32.f32 %s1200_s19  ;;  %s428_s17 = sadd.s32 33, %s882_s13  ;;  %v413_v57 = vsel %vm318_vm6, %v412_v50, %v405_v52  ;;  %v282_v3 = vld [vmem:[%s281_s10] sm:$0x1] }
  0x74   : > { %s1204_s26 = scvt.s32.f32 %s1202_s11  ;;  %s1026_s16 = sld [smem:[#allocation3 + %s428_s17]]  ;;  %v311_v0 = vsel %vm310_vm2, %v309_v59, %v292_v58  ;;  %v284_v10 = vmul.f32 %v283_v1, %v282_v3 }
  0x75   : > { %v259_v45 = vstv %s1201_s6  ;;  %s1028_s4 = sld [smem:[#allocation4 + %s428_s17]]  ;;  %s436_s0 = sadd.s32 34, %s882_s13 }
  0x76   : > { %s1016_s9 = scalar_lea.vmem %s1203_s24, %s657_s7  ;;  %v267_v53 = vstv %s1204_s26  ;;  %v260_v54 = vmul.f32 %v259_v45, %v258_v49  ;;  %s444_s28 = sadd.s32 35, %s882_s13  ;;  %v304_v22 = vrot.slane %v284_v10, 1 }
  0x77   : > { %s793_s15 = smov 8   ;;  %s1034_s19 = sld [smem:[#allocation3 + %s436_s0]]  ;;  %v268_v61 = vmul.f32 %v267_v53, %v266_v55 }
  0x78   : > { %415 = vrot.lane.b32.xlu0 %v413_v57, %s793_s15  ;;  %s1036_s23 = sld [smem:[#allocation4 + %s436_s0]]  ;;  %s1205_s25 = scvt.s32.f32 %s932_s1  ;;  %v295_v63 = vrot.slane %v260_v54, 4 }
  0x79   : > { %s1043_s22 = sld [smem:[#allocation3 + %s444_s28]]  ;;  %s424_s11 = scalar_lea.vmem %s1016_s9, %s1018_s8  ;;  %v298_v5 = vrot.slane %v268_v61, 3 }
  0x7a   : > { %v275_v60 = vstv %s1205_s25  ;;  %s1045_s6 = sld [smem:[#allocation4 + %s444_s28]]  ;;  %s452_s7 = sadd.s32 36, %s882_s13  ;;  %v425_v4 = vld [vmem:[%s424_s11] sm:$0x1]  ;;  %v313_v8 = vsel %vm312_vm3, %v311_v0, %v295_v63 }
  0x7b   : > { %s423_s30 = scvt.s32.f32 %s1020_s3  ;;  %s1052_s1 = sld [smem:[#allocation3 + %s452_s7]]  ;;  %v276_v2 = vmul.f32 %v275_v60, %v274_v62  ;;  %v315_v17 = vsel %vm314_vm4, %v313_v8, %v298_v5 }
  0x7c   : > { %s431_s14 = scvt.s32.f32 %s1028_s4  ;;  %s432_s21 = scalar_lea.vmem %s1016_s9, %s1026_s16 }
  0x7d   : > { %v426_v6 = vstv %s423_s30  ;;  %v433_v7 = vld [vmem:[%s432_s21] sm:$0x1]  ;;  %s1062_s27 = sld [smem:[#allocation4 + %s452_s7]]  ;;  %s460_s12 = sadd.s32 37, %s882_s13  ;;  %v301_v14 = vrot.slane %v276_v2, 2 }
  0x7e   : > { %v434_v9 = vstv %s431_s14  ;;  %s439_s29 = scvt.s32.f32 %s1036_s23  ;;  %s440_s18 = scalar_lea.vmem %s1016_s9, %s1034_s19  ;;  %v427_v11 = vmul.f32 %v426_v6, %v425_v4 }
  0x7f   : > { %v435_v12 = vmul.f32 %v434_v9, %v433_v7  ;;  %v441_v13 = vld [vmem:[%s440_s18] sm:$0x1]  ;;  %s448_s20 = scalar_lea.vmem %s1016_s9, %s1043_s22  ;;  %s461_s10 = sld [smem:[#allocation3 + %s460_s12]]  ;;  %v317_v26 = vsel %vm316_vm5, %v315_v17, %v301_v14 }
  0x80   : > { %s447_s5 = scvt.s32.f32 %s1045_s6  ;;  %v442_v15 = vstv %s439_s29  ;;  %v449_v16 = vld [vmem:[%s448_s20] sm:$0x1]  ;;  %s1072_s24 = sld [smem:[#allocation4 + %s460_s12]]  ;;  %v319_v31 = vsel %vm318_vm6, %v317_v26, %v304_v22 }
  0x81   : > { %v443_v18 = vmul.f32 %v442_v15, %v441_v13  ;;  %s456_s8 = scalar_lea.vmem %s1016_s9, %s1052_s1  ;;  %s468_s3 = sadd.s32 38, %s882_s13  ;;  %v485_v20 = vrot.slane %v435_v12, 7 }
  0x82   : > { %v450_v19 = vstv %s447_s5  ;;  %s1206_s17 = sld [smem:[#allocation10_spill]]  ;;  %v457_v23 = vld [vmem:[%s456_s8] sm:$0x1]  ;;  %s476_s0 = sadd.s32 39, %s882_s13 }
  0x83   : > { %v451_v21 = vmul.f32 %v450_v19, %v449_v16  ;;  %s469_s26 = sld [smem:[#allocation3 + %s468_s3]]  ;;  %s455_s4 = scvt.s32.f32 %s1062_s27  ;;  %v488_v24 = vrot.slane %v443_v18, 6  ;;  %v505_v25 = vsel %vm306_vm0, %v427_v11, %v485_v20 }
  0x84   : > { %s470_s16 = sld [smem:[#allocation4 + %s468_s3]]  ;;  %s794_s14 = smov 16  }
  0x85   : > { %s477_s28 = sld [smem:[#allocation3 + %s476_s0]]  ;;  %v491_v27 = vrot.slane %v451_v21, 5  ;;  %v458_v28 = vstv %s455_s4  ;;  %v506_v29 = vsel %vm308_vm1, %v505_v25, %v488_v24  ;;  %s464_s25 = scalar_lea.vmem %s1016_s9, %s461_s10 }
  0x86   : > { %s478_s15 = sld [smem:[#allocation4 + %s476_s0]]  ;;  %v459_v30 = vmul.f32 %v458_v28, %v457_v23  ;;  %s463_s23 = scvt.s32.f32 %s1072_s24  ;;  %v465_v32 = vld [vmem:[%s464_s25] sm:$0x1] }
  0x87   : > { %v507_v33 = vsel %vm310_vm2, %v506_v29, %v491_v27  ;;  %s1207_s1 = sld [smem:[#allocation13_spill]]  ;;  %s1209_s18 = sld [smem:[#allocation28_spill]] }
  0x88   : > { %s203_s19 = sand.u32 1, %s1206_s17   ;;  %v466_v34 = vstv %s463_s23  ;;  %v494_v35 = vrot.slane %v459_v30, 4  ;;  %s795_s24 = smov [#allocation5]  }
  0x89   : > { %s643_s13 = sshll.u32 %s203_s19, 3  ;;  %s472_s6 = scalar_lea.vmem %s1016_s9, %s469_s26  ;;  %v467_v36 = vmul.f32 %v466_v34, %v465_v32 }
  0x8a   : > { %s471_s22 = scvt.s32.f32 %s470_s16  ;;  %v473_v37 = vld [vmem:[%s472_s6] sm:$0x1]  ;;  %v508_v39 = vsel %vm312_vm3, %v507_v33, %v494_v35  ;;  %s205_s30 = scalar_lea.vmem [#allocation5], %s643_s13 }
  0x8b   : > { %s480_s7 = scalar_lea.vmem %s1016_s9, %s477_s28  ;;  %321 = vst.msk [vmem:[%s205_s30] sm:$0xff] %vm320_vm7, %v319_v31  ;;  %v497_v42 = vrot.slane %v467_v36, 3  ;;  %s532_s27 = sshll.u32 %s205_s30, 4  ;;  %s1102_s27 = int_to_ptr.vmem [resolvable:$true] %s532_s27 }
  0x8c   : > { %v474_v38 = vstv %s471_s22  ;;  %s479_s11 = scvt.s32.f32 %s478_s15  ;;  %v481_v41 = vld [vmem:[%s480_s7] sm:$0x1]  ;;  %s519_s20 = scalar_lea.sflag [#allocation6], %s203_s19 }
  0x8d   : > { %v475_v40 = vmul.f32 %v474_v38, %v473_v37  ;;  %v509_v46 = vsel %vm314_vm4, %v508_v39, %v497_v42  ;;  %s652_s21 = sshll.u32 %s1207_s1, 7  ;;  %s725_s10 = scalar_lea.vmem %s1102_s27, 128 }
  0x8e   : > { %v482_v43 = vstv %s479_s11  ;;  %s1100_s5 = scalar_lea.hbm %s1209_s18, %s652_s21  ;;  %p726_p7 = scmp.ne.s32.totalorder %s1102_s27, %s725_s10 }
  0x8f   : > { %v483_v44 = vmul.f32 %v482_v43, %v481_v41  ;;  %v500_v45 = vrot.slane %v475_v40, 2  ;;  %s729_s8 = sshll.u32 %s795_s24, 4  ;;  %s730_s8 = int_to_ptr.vmem [resolvable:$false] %s729_s8 }
  0x90   : > { %p727_p8 = pnand %p726_p7, %p870_p1  ;;  %s731_s3 = scalar_lea.vmem %s730_s8, 256 }
  0x91   : > { %v503_v47 = vrot.slane %v483_v44, 1  ;;  %v510_v48 = vsel %vm316_vm5, %v509_v46, %v500_v45  ;;  %p732_p10 = scmp.lt.s32.totalorder %s1102_s27, %s730_s8  ;;  %p733_p11 = scmp.lt.s32.totalorder %s731_s3, %s725_s10 }
  0x92   : > { %p728_p9 = pneg %p727_p8 }
  0x93   : > { %v511_v49 = vsel %vm318_vm6, %v510_v48, %v503_v47  ;;  %p734_p12 = por %p733_p11, %p732_p10 }
  0x94   : > { %513 = vrot.lane.b32.xlu0 %v511_v49, %s794_s14 }
  0x95   : > { %p735_p13 = pnand %p734_p12, %p728_p9 }
  0xea   : > { %v416_v50 = vpop.permute.xlu0 %415 }
  0xeb   : > { %419 = vst.msk [vmem:[%s205_s30] sm:$0xff] %vm418_vm8, %v416_v50 }
 0x106   : > { %v514_v51 = vpop.permute.xlu0 %513 }
 0x107   : > { %517 = vst.msk [vmem:[%s205_s30] sm:$0xff] %vm516_vm9, %v514_v51 }
 0x108   : > { %738 = shalt.err (!%p735_p13)
}
 0x109   : > { %s739_s17 = scalar_lea.hbm %s1100_s5, 128  ;;  %s743_s4 = scalar_lea.hbm %s1209_s18, 256 }
 0x10a   : > { %p740_p0 = scmp.ne.s32.totalorder %s1100_s5, %s739_s17  ;;  %p744_p5 = scmp.lt.u32.totalorder %s1100_s5, %s1209_s18 }
 0x10b   : > { %p745_p6 = scmp.lt.u32.totalorder %s743_s4, %s739_s17  ;;  %p747_p8 = scmp.lt.u32.totalorder %s739_s17, %s1100_s5 }
 0x10c   : > { %p741_p3 = pnand %p740_p0, %p870_p1 }
 0x10d   : > { %p746_p7 = por %p745_p6, %p744_p5 }
 0x10e   : > { %p742_p4 = pneg %p741_p3 }
 0x10f   : > { %p748_p9 = por %p747_p8, %p746_p7 }
 0x111   : > { %p749_p10 = pnand %p748_p9, %p742_p4 }
 0x113   : > { %752 = shalt.err (!%p749_p10)
}
 0x114   : > { %658 = dma.vmem_to_hbm [thread:$0]  (%p870_p1), %s1102_s27, 128, %s1100_s5, %s519_s20  }
 0x115 PF: > { %s1210_s15 = sld [smem:[#allocation12_spill]]  ;;  %s1211_s19 = sld [smem:[#allocation9_spill]] }
 0x11b   : > { %p664_p11 = scmp.ge.s32.totalorder %s1210_s15, 2  ;;  %s544_s25 = sand.u32 1, %s1211_s19  }
 0x11c   : > { %s545_s13 = scalar_lea.sflag [#allocation6], %s544_s25 }
 0x11d   : > { %p661_p12 = pnand %p664_p11, %p874_p2 }
 0x11f   : > { %772 = dma.done.wait (!%p661_p12), %s545_s13, 128  }
 0x120   : > { %774 = vsyncadd (!%p661_p12), %s545_s13, 4294967168  ;;  %s1213_s29 = sld [smem:[#allocation14_spill]]  ;;  %s1214_s1 = sld [smem:[#allocation10_spill]] }
 0x121   : > { %s1215_s27 = sld [smem:[#allocation11_spill]]  ;;  %s1216_s28 = sld [smem:[#allocation15_spill]] }
 0x126   : > { %p25_p13 = scmp.ge.s32.totalorder %s1213_s29, 4  }
 0x128   :  { %27 = sbr.rel (!%p25_p13) target bundleno = 30 (0x1e), region = 97 }
 0x12f   :  { %550 = vsyncpa [#allocation6], 1 }
 0x130   :  { %552 = vsyncpa [#allocation6 + $0x1], 1 }

</bundles_post_ra>
